<compile_context>
chip_gen: v6e
topology: v6e:2x2x1
jax: 0.10.0
libtpu: 0.0.40
codegen_flags: <defaults>
</compile_context>

<pallas_src>
import functools

import jax
import jax.numpy as jnp
from jax.experimental import pallas as pl
from jax.experimental.pallas import tpu as pltpu

RSQRT2 = 2.0 ** (-0.5)


def _round_up(n, m):
    return ((n + m - 1) // m) * m


# ---------------------------------------------------------------------------
# Kernel 1: row-tiled linear projection  y = x @ w + b
# ---------------------------------------------------------------------------
def _linear_kernel(x_ref, w_ref, b_ref, o_ref):
    # Feed the MXU in the input dtype; accumulate in f32.
    acc = jnp.dot(x_ref[...], w_ref[...], preferred_element_type=jnp.float32)
    acc = acc + b_ref[...].astype(jnp.float32)      # (1, Dout) broadcasts
    o_ref[...] = acc.astype(o_ref.dtype)


def linear_project(x2d, w, b, *, tm_max=512):
    """y = x2d @ w + b with M-tiling; weight/bias resident across the grid."""
    m, din = x2d.shape
    dout = w.shape[1]

    # Row tile: multiple of 8 sublanes, up to tm_max (512 keeps the tile +
    # double buffers well inside v7x's 32 MiB scoped VMEM for D up to ~4k).
    tm = min(tm_max, _round_up(m, 8))
    mp = _round_up(m, tm)
    xp = x2d if mp == m else jnp.pad(x2d, ((0, mp - m), (0, 0)))
    b2d = b.reshape(1, dout)

    itemsize = int(jnp.dtype(x2d.dtype).itemsize)
    cost = pl.CostEstimate(
        flops=2 * mp * din * dout,
        transcendentals=0,
        bytes_accessed=itemsize * (mp * din + din * dout + dout + mp * dout),
    )

    out = pl.pallas_call(
        _linear_kernel,
        out_shape=jax.ShapeDtypeStruct((mp, dout), x2d.dtype),
        grid_spec=pltpu.PrefetchScalarGridSpec(
            num_scalar_prefetch=0,
            grid=(mp // tm,),
            in_specs=[
                pl.BlockSpec((tm, din), lambda i: (i, 0)),    # activations: tiled
                pl.BlockSpec((din, dout), lambda i: (0, 0)),  # weight: resident
                pl.BlockSpec((1, dout), lambda i: (0, 0)),    # bias: resident
            ],
            out_specs=pl.BlockSpec((tm, dout), lambda i: (i, 0)),
        ),
        compiler_params=pltpu.CompilerParams(
            dimension_semantics=("parallel",)),
        cost_estimate=cost,
    )(xp, w, b2d)
    return out[:m]


# ---------------------------------------------------------------------------
# Kernel 2: per-(batch, head) attention with fused residual + RSQRT2 scale
# ---------------------------------------------------------------------------
def _attention_kernel(q_ref, k_ref, v_ref, res_ref, o_ref, *, scale):
    # scores [L, S] = q [L, dqk] . k [S, dqk]^T   (contract on head dim,
    # no materialized transpose), accumulated in f32.
    s = jax.lax.dot_general(
        q_ref[...], k_ref[...],
        dimension_numbers=(((1,), (1,)), ((), ())),
        preferred_element_type=jnp.float32,
    ) * scale
    m = jnp.max(s, axis=-1, keepdims=True)
    p = jnp.exp(s - m)
    attn = p / jnp.sum(p, axis=-1, keepdims=True)
    # TODO(synk): nn.Dropout on `attn` is Identity for dropout=0 (default);
    # p > 0 is not implemented here.
    o = jnp.dot(attn.astype(v_ref.dtype), v_ref[...],
                preferred_element_type=jnp.float32)            # [L, dv]
    o_ref[...] = ((o + res_ref[...].astype(jnp.float32)) * RSQRT2).astype(o_ref.dtype)


def cross_attention(x, latents, wq, bq, wk, bk, *, num_heads):
    """CrossAttention forward (default config: v/out/residual are Identity).

    Args:
      x:        [batch, seq, input_dim]
      latents:  [1, num_latent_tokens, input_dim]
      wq, wk:   [input_dim, qk_dim]   (transposed vs PyTorch: kernel does x @ w)
      bq, bk:   [qk_dim]
    Returns:
      [batch, num_latent_tokens, input_dim]
    """
    B, S, D = x.shape
    L = latents.shape[1]
    dl = latents.shape[2]
    H = num_heads
    qk_dim = wq.shape[1]
    head_qk = qk_dim // H
    head_v = D // H                      # default: v = Identity, v_dim = input_dim
    scale = float(head_qk) ** -0.5

    # TODO(synk): non-default configs (Linear v/out/residual when dims differ,
    # LayerNorm latent_prenorm) are Identity in the default config and are not
    # implemented here.

    # ---- projections (Pallas, row-tiled matmuls) ----
    q2d = linear_project(latents.reshape(L, dl), wq, bq)      # [L, qk_dim]
    k2d = linear_project(x.reshape(B * S, D), wk, bk)         # [B*S, qk_dim]

    # ---- head split: JAX-side layout plumbing ----
    q_heads = q2d.reshape(L, H, head_qk).transpose(1, 0, 2)             # [H, L, dqk]
    k_heads = k2d.reshape(B, S, H, head_qk).transpose(0, 2, 1, 3)       # [B, H, S, dqk]
    v_heads = x.reshape(B, S, H, head_v).transpose(0, 2, 1, 3)          # [B, H, S, dv]
    res_heads = latents.reshape(L, H, head_v).transpose(1, 0, 2)        # [H, L, dv]

    itemsize = int(jnp.dtype(x.dtype).itemsize)
    cost = pl.CostEstimate(
        flops=int(B * H * (2 * L * S * head_qk + 2 * L * S * head_v + 4 * L * S)),
        transcendentals=int(B * H * L * S),
        bytes_accessed=itemsize * int(
            H * L * head_qk + B * H * S * head_qk + B * H * S * head_v
            + H * L * head_v + B * H * L * head_v),
    )

    out_heads = pl.pallas_call(
        functools.partial(_attention_kernel, scale=scale),
        out_shape=jax.ShapeDtypeStruct((B, H, L, head_v), x.dtype),
        grid_spec=pltpu.PrefetchScalarGridSpec(
            num_scalar_prefetch=0,
            grid=(B, H),
            in_specs=[
                pl.BlockSpec((None, L, head_qk), lambda b, h: (h, 0, 0)),
                pl.BlockSpec((None, None, S, head_qk), lambda b, h: (b, h, 0, 0)),
                pl.BlockSpec((None, None, S, head_v), lambda b, h: (b, h, 0, 0)),
                pl.BlockSpec((None, L, head_v), lambda b, h: (h, 0, 0)),
            ],
            out_specs=pl.BlockSpec((None, None, L, head_v),
                                   lambda b, h: (b, h, 0, 0)),
        ),
        compiler_params=pltpu.CompilerParams(
            dimension_semantics=("parallel", "parallel")),
        cost_estimate=cost,
    )(q_heads, k_heads, v_heads, res_heads)

    # head merge: [B, H, L, dv] -> [B, L, H*dv]
    return out_heads.transpose(0, 2, 1, 3).reshape(B, L, H * head_v)


# ---------------------------------------------------------------------------
# Pure-JAX reference for correctness checking.
# ---------------------------------------------------------------------------
def cross_attention_ref(x, latents, wq, bq, wk, bk, *, num_heads):
    B, S, D = x.shape
    L = latents.shape[1]
    H = num_heads
    hp = jax.lax.Precision.HIGHEST
    q = jnp.einsum("ld,de->le", latents[0], wq, precision=hp) + bq
    k = jnp.einsum("bsd,de->bse", x, wk, precision=hp) + bk
    dqk = q.shape[-1] // H
    dv = D // H
    qh = q.reshape(L, H, dqk).transpose(1, 0, 2)                    # [H, L, dqk]
    kh = k.reshape(B, S, H, dqk).transpose(0, 2, 1, 3)              # [B, H, S, dqk]
    vh = x.reshape(B, S, H, dv).transpose(0, 2, 1, 3)               # [B, H, S, dv]
    sim = jnp.einsum("hid,bhjd->bhij", qh, kh, precision=hp) * (dqk ** -0.5)
    attn = jax.nn.softmax(sim, axis=-1)
    out = jnp.einsum("bhij,bhjd->bhid", attn, vh, precision=hp)
    out = out.transpose(0, 2, 1, 3).reshape(B, L, D)
    return (out + latents) * RSQRT2


if __name__ == "__main__":
    key = jax.random.PRNGKey(0)
    kx, kl, kwq, kbq, kwk, kbk = jax.random.split(key, 6)

    batch, seq, input_dim = 2, 8, 32
    num_heads, num_latent_tokens = 4, 8
    qk_dim = input_dim  # default config: qk_dim = attention_dim * num_heads = input_dim

    x = jax.random.normal(kx, (batch, seq, input_dim), dtype=jnp.float32)
    latents = jax.random.normal(kl, (1, num_latent_tokens, input_dim),
                                dtype=jnp.float32)
    # Weights are stored transposed vs PyTorch ([in, out]) so kernels do x @ w.
    wq = jax.random.normal(kwq, (input_dim, qk_dim), dtype=jnp.float32) * input_dim ** -0.5
    bq = jax.random.normal(kbq, (qk_dim,), dtype=jnp.float32) * 0.1
    wk = jax.random.normal(kwk, (input_dim, qk_dim), dtype=jnp.float32) * input_dim ** -0.5
    bk = jax.random.normal(kbk, (qk_dim,), dtype=jnp.float32) * 0.1

    fwd = jax.jit(functools.partial(cross_attention, num_heads=num_heads))
    out = fwd(x, latents, wq, bq, wk, bk)
    jax.block_until_ready(out)

    ref = cross_attention_ref(x, latents, wq, bq, wk, bk, num_heads=num_heads)
    assert out.shape == (batch, num_latent_tokens, input_dim), out.shape
    assert out.dtype == x.dtype, out.dtype
    err = float(jnp.max(jnp.abs(out - ref)))
    assert jnp.allclose(out, ref, atol=1e-4, rtol=1e-4), f"mismatch vs reference, max |err|={err}"

    print("KERNEL_OK")
</pallas_src>

<mosaic_0001>
module attributes {stable_mosaic.version = 11 : i64} {
  func.func @_linear_kernel(%arg0: i32, %arg1: memref<16x32xf32, #tpu.memory_space<vmem>>, %arg2: memref<32x32xf32, #tpu.memory_space<vmem>>, %arg3: memref<1x32xf32, #tpu.memory_space<vmem>>, %arg4: memref<16x32xf32, #tpu.memory_space<vmem>>) attributes {dimension_semantics = [#tpu.dimension_semantics<parallel>], iteration_bounds = array<i64: 1>, scalar_prefetch = 0 : i64, scratch_operands = 0 : i64, tpu.core_type = #tpu.core_type<tc>, window_params = [{transform_indices = @transform_0, window_bounds = array<i64: 16, 32>}, {pipeline_mode = #tpu.pipeline_mode<synchronous>, transform_indices = @transform_1, window_bounds = array<i64: 32, 32>}, {pipeline_mode = #tpu.pipeline_mode<synchronous>, transform_indices = @transform_2, window_bounds = array<i64: 1, 32>}, {transform_indices = @transform_3, window_bounds = array<i64: 16, 32>}]} {
    %c0 = arith.constant 0 : index
    %c0_0 = arith.constant 0 : index
    %0 = vector.load %arg1[%c0, %c0_0] : memref<16x32xf32, #tpu.memory_space<vmem>>, vector<16x32xf32>
    %c0_1 = arith.constant 0 : index
    %c0_2 = arith.constant 0 : index
    %1 = vector.load %arg2[%c0_1, %c0_2] : memref<32x32xf32, #tpu.memory_space<vmem>>, vector<32x32xf32>
    %cst = arith.constant dense<0.000000e+00> : vector<16x32xf32>
    %2 = tpu.matmul %0, %1, %cst {dimension_numbers = #tpu.dot_dimension_numbers<[1], [0], [0], [1], [0, 0, 1, 1], [], []>} : vector<16x32xf32>, vector<32x32xf32>, vector<16x32xf32> -> vector<16x32xf32>
    %c0_3 = arith.constant 0 : index
    %c0_4 = arith.constant 0 : index
    %3 = vector.load %arg3[%c0_3, %c0_4] : memref<1x32xf32, #tpu.memory_space<vmem>>, vector<1x32xf32>
    %4 = vector.broadcast %3 : vector<1x32xf32> to vector<16x32xf32>
    %5 = arith.addf %2, %4 : vector<16x32xf32>
    %c0_5 = arith.constant 0 : index
    %c0_6 = arith.constant 0 : index
    %6 = vector.load %arg4[%c0_5, %c0_6] : memref<16x32xf32, #tpu.memory_space<vmem>>, vector<16x32xf32>
    tpu.vector_store %arg4[%c0_5, %c0_6], %5 {strides = array<i32>} : memref<16x32xf32, #tpu.memory_space<vmem>>, vector<16x32xf32>,
    return
  }
  func.func @transform_0(%arg0: i32) -> (i32, i32) {
    %c0_i32 = arith.constant 0 : i32
    %c0_i32_0 = arith.constant 0 : i32
    return %arg0, %c0_i32 : i32, i32
  }
  func.func @transform_1(%arg0: i32) -> (i32, i32) {
    %c0_i32 = arith.constant 0 : i32
    %c0_i32_0 = arith.constant 0 : i32
    %c0_i32_1 = arith.constant 0 : i32
    return %c0_i32, %c0_i32_0 : i32, i32
  }
  func.func @transform_2(%arg0: i32) -> (i32, i32) {
    %c0_i32 = arith.constant 0 : i32
    %c0_i32_0 = arith.constant 0 : i32
    %c0_i32_1 = arith.constant 0 : i32
    return %c0_i32, %c0_i32_0 : i32, i32
  }
  func.func @transform_3(%arg0: i32) -> (i32, i32) {
    %c0_i32 = arith.constant 0 : i32
    %c0_i32_0 = arith.constant 0 : i32
    return %arg0, %c0_i32 : i32, i32
  }
}

module attributes {stable_mosaic.version = 11 : i64} {
  func.func @_linear_kernel(%arg0: i32, %arg1: memref<8x32xf32, #tpu.memory_space<vmem>>, %arg2: memref<32x32xf32, #tpu.memory_space<vmem>>, %arg3: memref<1x32xf32, #tpu.memory_space<vmem>>, %arg4: memref<8x32xf32, #tpu.memory_space<vmem>>) attributes {dimension_semantics = [#tpu.dimension_semantics<parallel>], iteration_bounds = array<i64: 1>, scalar_prefetch = 0 : i64, scratch_operands = 0 : i64, tpu.core_type = #tpu.core_type<tc>, window_params = [{transform_indices = @transform_0, window_bounds = array<i64: 8, 32>}, {pipeline_mode = #tpu.pipeline_mode<synchronous>, transform_indices = @transform_1, window_bounds = array<i64: 32, 32>}, {pipeline_mode = #tpu.pipeline_mode<synchronous>, transform_indices = @transform_2, window_bounds = array<i64: 1, 32>}, {transform_indices = @transform_3, window_bounds = array<i64: 8, 32>}]} {
    %c0 = arith.constant 0 : index
    %c0_0 = arith.constant 0 : index
    %0 = vector.load %arg1[%c0, %c0_0] : memref<8x32xf32, #tpu.memory_space<vmem>>, vector<8x32xf32>
    %c0_1 = arith.constant 0 : index
    %c0_2 = arith.constant 0 : index
    %1 = vector.load %arg2[%c0_1, %c0_2] : memref<32x32xf32, #tpu.memory_space<vmem>>, vector<32x32xf32>
    %cst = arith.constant dense<0.000000e+00> : vector<8x32xf32>
    %2 = tpu.matmul %0, %1, %cst {dimension_numbers = #tpu.dot_dimension_numbers<[1], [0], [0], [1], [0, 0, 1, 1], [], []>} : vector<8x32xf32>, vector<32x32xf32>, vector<8x32xf32> -> vector<8x32xf32>
    %c0_3 = arith.constant 0 : index
    %c0_4 = arith.constant 0 : index
    %3 = vector.load %arg3[%c0_3, %c0_4] : memref<1x32xf32, #tpu.memory_space<vmem>>, vector<1x32xf32>
    %4 = vector.broadcast %3 : vector<1x32xf32> to vector<8x32xf32>
    %5 = arith.addf %2, %4 : vector<8x32xf32>
    %c0_5 = arith.constant 0 : index
    %c0_6 = arith.constant 0 : index
    %6 = vector.load %arg4[%c0_5, %c0_6] : memref<8x32xf32, #tpu.memory_space<vmem>>, vector<8x32xf32>
    tpu.vector_store %arg4[%c0_5, %c0_6], %5 {strides = array<i32>} : memref<8x32xf32, #tpu.memory_space<vmem>>, vector<8x32xf32>,
    return
  }
  func.func @transform_0(%arg0: i32) -> (i32, i32) {
    %c0_i32 = arith.constant 0 : i32
    %c0_i32_0 = arith.constant 0 : i32
    return %arg0, %c0_i32 : i32, i32
  }
  func.func @transform_1(%arg0: i32) -> (i32, i32) {
    %c0_i32 = arith.constant 0 : i32
    %c0_i32_0 = arith.constant 0 : i32
    %c0_i32_1 = arith.constant 0 : i32
    return %c0_i32, %c0_i32_0 : i32, i32
  }
  func.func @transform_2(%arg0: i32) -> (i32, i32) {
    %c0_i32 = arith.constant 0 : i32
    %c0_i32_0 = arith.constant 0 : i32
    %c0_i32_1 = arith.constant 0 : i32
    return %c0_i32, %c0_i32_0 : i32, i32
  }
  func.func @transform_3(%arg0: i32) -> (i32, i32) {
    %c0_i32 = arith.constant 0 : i32
    %c0_i32_0 = arith.constant 0 : i32
    return %arg0, %c0_i32 : i32, i32
  }
}

module attributes {stable_mosaic.version = 11 : i64} {
  func.func @_attention_kernel(%arg0: i32, %arg1: i32, %arg2: memref<1x8x8xf32, #tpu.memory_space<vmem>>, %arg3: memref<1x1x8x8xf32, #tpu.memory_space<vmem>>, %arg4: memref<1x1x8x8xf32, #tpu.memory_space<vmem>>, %arg5: memref<1x8x8xf32, #tpu.memory_space<vmem>>, %arg6: memref<1x1x8x8xf32, #tpu.memory_space<vmem>>) attributes {dimension_semantics = [#tpu.dimension_semantics<parallel>, #tpu.dimension_semantics<parallel>], iteration_bounds = array<i64: 2, 4>, scalar_prefetch = 0 : i64, scratch_operands = 0 : i64, tpu.core_type = #tpu.core_type<tc>, window_params = [{transform_indices = @transform_0, window_bounds = array<i64: 1, 8, 8>}, {transform_indices = @transform_1, window_bounds = array<i64: 1, 1, 8, 8>}, {transform_indices = @transform_2, window_bounds = array<i64: 1, 1, 8, 8>}, {transform_indices = @transform_3, window_bounds = array<i64: 1, 8, 8>}, {transform_indices = @transform_4, window_bounds = array<i64: 1, 1, 8, 8>}]} {
    %c0 = arith.constant 0 : index
    %c0_0 = arith.constant 0 : index
    %c0_1 = arith.constant 0 : index
    %0 = vector.load %arg2[%c0, %c0_0, %c0_1] : memref<1x8x8xf32, #tpu.memory_space<vmem>>, vector<1x8x8xf32>
    %1 = vector.shape_cast %0 : vector<1x8x8xf32> to vector<8x8xf32>
    %c0_2 = arith.constant 0 : index
    %c0_3 = arith.constant 0 : index
    %c0_4 = arith.constant 0 : index
    %c0_5 = arith.constant 0 : index
    %2 = vector.load %arg3[%c0_2, %c0_3, %c0_4, %c0_5] : memref<1x1x8x8xf32, #tpu.memory_space<vmem>>, vector<1x1x8x8xf32>
    %3 = vector.shape_cast %2 : vector<1x1x8x8xf32> to vector<8x8xf32>
    %cst = arith.constant dense<0.000000e+00> : vector<8x8xf32>
    %4 = tpu.matmul %1, %3, %cst {dimension_numbers = #tpu.dot_dimension_numbers<[1], [1], [0], [0], [0, 0, 1, 0], [], []>} : vector<8x8xf32>, vector<8x8xf32>, vector<8x8xf32> -> vector<8x8xf32>
    %cst_6 = arith.constant 0.353553385 : f32
    %5 = vector.broadcast %cst_6 : f32 to vector<8x8xf32>
    %6 = arith.mulf %4, %5 : vector<8x8xf32>
    %cst_7 = arith.constant dense<0xFF800000> : vector<8xf32>
    %7 = vector.multi_reduction <maximumf>, %6, %cst_7 [1] : vector<8x8xf32> to vector<8xf32>
    %8 = vector.shape_cast %7 : vector<8xf32> to vector<8x1xf32>
    %9 = vector.broadcast %8 : vector<8x1xf32> to vector<8x8xf32>
    %10 = arith.subf %6, %9 : vector<8x8xf32>
    %11 = math.exp %10 : vector<8x8xf32>
    %cst_8 = arith.constant dense<0.000000e+00> : vector<8xf32>
    %12 = vector.multi_reduction <add>, %11, %cst_8 [1] : vector<8x8xf32> to vector<8xf32>
    %13 = vector.shape_cast %12 : vector<8xf32> to vector<8x1xf32>
    %14 = vector.broadcast %13 : vector<8x1xf32> to vector<8x8xf32>
    %15 = arith.divf %11, %14 : vector<8x8xf32>
    %c0_9 = arith.constant 0 : index
    %c0_10 = arith.constant 0 : index
    %c0_11 = arith.constant 0 : index
    %c0_12 = arith.constant 0 : index
    %16 = vector.load %arg4[%c0_9, %c0_10, %c0_11, %c0_12] : memref<1x1x8x8xf32, #tpu.memory_space<vmem>>, vector<1x1x8x8xf32>
    %17 = vector.shape_cast %16 : vector<1x1x8x8xf32> to vector<8x8xf32>
    %cst_13 = arith.constant dense<0.000000e+00> : vector<8x8xf32>
    %18 = tpu.matmul %15, %17, %cst_13 {dimension_numbers = #tpu.dot_dimension_numbers<[1], [0], [0], [1], [0, 0, 1, 1], [], []>} : vector<8x8xf32>, vector<8x8xf32>, vector<8x8xf32> -> vector<8x8xf32>
    %c0_14 = arith.constant 0 : index
    %c0_15 = arith.constant 0 : index
    %c0_16 = arith.constant 0 : index
    %19 = vector.load %arg5[%c0_14, %c0_15, %c0_16] : memref<1x8x8xf32, #tpu.memory_space<vmem>>, vector<1x8x8xf32>
    %20 = vector.shape_cast %19 : vector<1x8x8xf32> to vector<8x8xf32>
    %21 = arith.addf %18, %20 : vector<8x8xf32>
    %cst_17 = arith.constant 0.707106769 : f32
    %22 = vector.broadcast %cst_17 : f32 to vector<8x8xf32>
    %23 = arith.mulf %21, %22 : vector<8x8xf32>
    %c0_18 = arith.constant 0 : index
    %c0_19 = arith.constant 0 : index
    %c0_20 = arith.constant 0 : index
    %c0_21 = arith.constant 0 : index
    %24 = vector.load %arg6[%c0_18, %c0_19, %c0_20, %c0_21] : memref<1x1x8x8xf32, #tpu.memory_space<vmem>>, vector<1x1x8x8xf32>
    %25 = vector.shape_cast %24 : vector<1x1x8x8xf32> to vector<8x8xf32>
    %26 = vector.shape_cast %23 : vector<8x8xf32> to vector<1x1x8x8xf32>
    tpu.vector_store %arg6[%c0_18, %c0_19, %c0_20, %c0_21], %26 {strides = array<i32>} : memref<1x1x8x8xf32, #tpu.memory_space<vmem>>, vector<1x1x8x8xf32>,
    return
  }
  func.func @transform_0(%arg0: i32, %arg1: i32) -> (i32, i32, i32) {
    %c0_i32 = arith.constant 0 : i32
    %c0_i32_0 = arith.constant 0 : i32
    %c0_i32_1 = arith.constant 0 : i32
    return %arg1, %c0_i32, %c0_i32_0 : i32, i32, i32
  }
  func.func @transform_1(%arg0: i32, %arg1: i32) -> (i32, i32, i32, i32) {
    %c0_i32 = arith.constant 0 : i32
    %c0_i32_0 = arith.constant 0 : i32
    %c0_i32_1 = arith.constant 0 : i32
    return %arg0, %arg1, %c0_i32, %c0_i32_0 : i32, i32, i32, i32
  }
  func.func @transform_2(%arg0: i32, %arg1: i32) -> (i32, i32, i32, i32) {
    %c0_i32 = arith.constant 0 : i32
    %c0_i32_0 = arith.constant 0 : i32
    %c0_i32_1 = arith.constant 0 : i32
    return %arg0, %arg1, %c0_i32, %c0_i32_0 : i32, i32, i32, i32
  }
  func.func @transform_3(%arg0: i32, %arg1: i32) -> (i32, i32, i32) {
    %c0_i32 = arith.constant 0 : i32
    %c0_i32_0 = arith.constant 0 : i32
    %c0_i32_1 = arith.constant 0 : i32
    return %arg1, %c0_i32, %c0_i32_0 : i32, i32, i32
  }
  func.func @transform_4(%arg0: i32, %arg1: i32) -> (i32, i32, i32, i32) {
    %c0_i32 = arith.constant 0 : i32
    %c0_i32_0 = arith.constant 0 : i32
    %c0_i32_1 = arith.constant 0 : i32
    return %arg0, %arg1, %c0_i32, %c0_i32_0 : i32, i32, i32, i32
  }
}

</mosaic_0001>

<bundles_post_ra>
// kernel: cross_attention.4
= control target key start
LH: loop header
LB: loop body
LE: loop exit
PB: predicated region body
PF: predicated region fallthrough
CT: control target
= control target key end

     0   :  { %8 = vsyncpa [#allocation3], 0  ;;  %s256_s0 = inlined_call_operand.hbm [shape: f32[16,32], index: 0, kind: input, shape index: {}]   ;;  %s257_s1 = inlined_call_operand.hbm [shape: f32[32,32], index: 1, kind: input, shape index: {}]   ;;  %s258_s2 = inlined_call_operand.vmem [shape: f32[1,32], index: 2, kind: input, shape index: {}]   ;;  %s259_s3 = inlined_call_operand.vmem [shape: f32[16,32], index: 3, kind: output, shape index: {}]  }
   0x1   :  { %9 = vsyncpa [#allocation5], 0  ;;  %s213_s12 = smov [#allocation2]  }
   0x2   :  { %s15_s13 = sshll.u32 %s213_s12, 4  ;;  %s16_s13 = int_to_ptr.vmem [resolvable:$true] %s15_s13 }
   0x3   :  { %s177_s14 = scalar_lea.vmem %s16_s13, 256  ;;  %p182_p1 = scmp.lt.s32.totalorder %s16_s13, %s16_s13 }
   0x4   :  { %p178_p0 = scmp.ne.s32.totalorder %s16_s13, %s177_s14  ;;  %p183_p2 = scmp.lt.s32.totalorder %s177_s14, %s177_s14 }
   0x6   :  { %p184_p3 = por %p183_p2, %p182_p1 }
   0x8   :  { %p185_p4 = pnand %p184_p3, %p178_p0 }
   0xa   :  { %188 = shalt.err (!%p185_p4)
}
   0xb   :  { %s214_s15 = smov 128   ;;  %s215_s16 = smov 8  }
   0xc   :  { %21 = dma.hbm_to_vmem [thread:$0]  %s256_s0, 256, %s16_s13, [#allocation3], %s214_s15, %s214_s15, %s215_s16  }
   0xd   :  { %s216_s19 = smov [#allocation4]  }
   0xe   :  { %s27_s20 = sshll.u32 %s216_s19, 4  ;;  %s28_s20 = int_to_ptr.vmem [resolvable:$true] %s27_s20 }
   0xf   :  { %s197_s21 = scalar_lea.vmem %s28_s20, 512  ;;  %p202_p6 = scmp.lt.s32.totalorder %s28_s20, %s28_s20 }
  0x10   :  { %p198_p5 = scmp.ne.s32.totalorder %s28_s20, %s197_s21  ;;  %p203_p7 = scmp.lt.s32.totalorder %s197_s21, %s197_s21 }
  0x12   :  { %p204_p8 = por %p203_p7, %p202_p6 }
  0x14   :  { %p205_p9 = pnand %p204_p8, %p198_p5 }
  0x16   :  { %208 = shalt.err (!%p205_p9)
}
  0x17   :  { %33 = dma.hbm_to_vmem [thread:$0]  %s257_s1, 512, %s28_s20, [#allocation5], %s214_s15, %s214_s15, %s215_s16  }
  0x18   :  { %209 = dma.done.wait [#allocation3], 256  }
  0x19   :  { %210 = vsyncadd [#allocation3], 4294967040 }
  0x1a   :  { %211 = dma.done.wait [#allocation5], 512  }
  0x1b   :  { %212 = vsyncadd [#allocation5], 4294966784  ;;  %vm55_vm0 = vcmask 261120   ;;  %v47_v0 = vld [vmem:[#allocation4 + $0x18] sm:$0xff]  ;;  %v46_v1 = vld [vmem:[#allocation4 + $0x10] sm:$0xff] }
  0x1c   :  { %154 = vmatprep.subr.mxu0 %v47_v0  ;;  %v42_v2 = vld [vmem:[#allocation2] sm:$0xff]  ;;  %v45_v3 = vld [vmem:[#allocation4 + $0x8] sm:$0xff]  ;;  %v44_v4 = vld [vmem:[#allocation4] sm:$0xff] }
  0x1d   :  { %155 = vmatpush3.msra.mxu0 %v47_v0  ;;  %162 = vmatprep.mubr.msk.f32.mxu0 %vm55_vm0, %v42_v2  ;;  %v43_v5 = vld [vmem:[#allocation2 + $0x8] sm:$0xff]  ;;  %v145_v6 = vld [vmem:[%s258_s2] ss:$0 sm:$0xff] }
  0x1e   :  { %156 = vmatprep.subr.mxu0 %v46_v1 }
  0x1f   :  { %157 = vmatpush3.msra.mxu0 %v46_v1 }
  0x20   :  { %158 = vmatprep.subr.mxu0 %v45_v3 }
  0x21   :  { %159 = vmatpush3.msra.mxu0 %v45_v3 }
  0x22   :  { %160 = vmatprep.subr.mxu0 %v44_v4 }
  0x23   :  { %161 = vmatpush3.msra.mxu0 %v44_v4 }
  0x24   :  { %163 = vmatmul.mubr.msk.f32.vlgmr.msra.gmra.mxu0 %vm55_vm0, %v43_v5 }
  0xe4   :  { %v164_v7 = vpop.f32.mrf.mxu0 }
  0xe5   :  { %v134_v8 = vadd.f32 %v164_v7, %v145_v6 }
  0xe6   :  { %v128_v9 = vpop.f32.mrf.mxu0 }
  0xe7   :  { %138 = vst.msk [vmem:[%s259_s3 + $0x8] sm:$0xff] %vm55_vm0, %v134_v8  ;;  %v129_v10 = vadd.f32 %v145_v6, %v128_v9 }
  0xe9   :  { %137 = vst.msk [vmem:[%s259_s3] sm:$0xff] %vm55_vm0, %v129_v10 }
  0xea   :  { %143 = vsyncpa [#allocation3], 1 }
  0xeb   :  { %144 = vsyncpa [#allocation5], 1 }

// kernel: cross_attention.3
= control target key start
LH: loop header
LB: loop body
LE: loop exit
PB: predicated region body
PF: predicated region fallthrough
CT: control target
= control target key end

     0   :  { %v125_v0 = vmov 0.0   ;;  %vm126_vm0 = vmmov 0   ;;  %vm26_vm1 = vcmask 261120   ;;  %s168_s1 = inlined_call_operand.vmem [shape: f32[32,32], index: 1, kind: input, shape index: {}]   ;;  %s169_s0 = inlined_call_operand.vmem [shape: f32[8,32], index: 0, kind: input, shape index: {}]   ;;  %s170_s2 = inlined_call_operand.vmem [shape: f32[1,32], index: 2, kind: input, shape index: {}]   ;;  %s171_s3 = inlined_call_operand.vmem [shape: f32[8,32], index: 3, kind: output, shape index: {}]  }
   0x1   :  { %112 = vmatprep.subr.mxu0 %v125_v0  ;;  %v18_v1 = vld [vmem:[%s168_s1 + $0x18] sm:$0xff]  ;;  %v17_v2 = vld [vmem:[%s168_s1 + $0x10] sm:$0xff]  ;;  %120 = vmatprep.mubr.msk.f32.mxu0 %vm126_vm0, %v125_v0  ;;  %v16_v3 = vld [vmem:[%s168_s1 + $0x8] sm:$0xff] }
   0x2   :  { %113 = vmatpush3.msra.mxu0 %v18_v1  ;;  %v15_v4 = vld [vmem:[%s168_s1] sm:$0xff] }
   0x3   :  { %114 = vmatprep.subr.mxu0 %v125_v0  ;;  %v14_v5 = vld [vmem:[%s169_s0] sm:$0xff] }
   0x4   :  { %115 = vmatpush3.msra.mxu0 %v17_v2  ;;  %v105_v6 = vld [vmem:[%s170_s2] ss:$0 sm:$0xff] }
   0x5   :  { %116 = vmatprep.subr.mxu0 %v125_v0 }
   0x6   :  { %117 = vmatpush3.msra.mxu0 %v16_v3 }
   0x7   :  { %118 = vmatprep.subr.mxu0 %v125_v0 }
   0x8   :  { %119 = vmatpush3.msra.mxu0 %v15_v4 }
   0x9   :  { %121 = vmatmul.mubr.msk.f32.vlgmr.msra.gmra.mxu0 %vm26_vm1, %v14_v5 }
  0xc9   :  { %v96_v7 = vpop.f32.mrf.mxu0 }
  0xca   :  { %v97_v8 = vadd.f32 %v105_v6, %v96_v7 }
  0xcb   :  { %v122_v9 = vpop.f32.mrf.mxu0 }
  0xcc   :  { %100 = vst.msk [vmem:[%s171_s3] sm:$0xff] %vm26_vm1, %v97_v8 }

// kernel: cross_attention.5
= control target key start
LH: loop header
LB: loop body
LE: loop exit
PB: predicated region body
PF: predicated region fallthrough
CT: control target
= control target key end

     0   :  { %s735_s15 = smov 0   ;;  %s737_s16 = smov 0   ;;  %s814_s0 = inlined_call_operand.vmem [shape: f32[4,8,8], index: 0, kind: input, shape index: {}]   ;;  %s815_s1 = inlined_call_operand.vmem [shape: f32[2,4,8,8], index: 1, kind: input, shape index: {}]   ;;  %s816_s2 = inlined_call_operand.vmem [shape: f32[2,4,8,8], index: 2, kind: input, shape index: {}]   ;;  %s817_s3 = inlined_call_operand.vmem [shape: f32[4,8,8], index: 3, kind: input, shape index: {}]   ;;  %s818_s4 = inlined_call_operand.vmem [shape: f32[2,4,8,8], index: 4, kind: output, shape index: {}]  }
   0x1   :  { %s739_s17 = smov 0   ;;  %s741_s18 = smov 0  }
   0x2   :  { %s743_s19 = smov 0  }
   0x3 LB: > { %s23_s20 = sadd.s32 1, %s698_s17  ;;  %s26_s21 = sadd.s32 1, %s702_s18  ;;  %s706_s19 = sphi %s743_s19, %s14_s19   ;;  %s702_s18 = sphi %s741_s18, %s822_s18   ;;  %s698_s17 = sphi %s739_s17, %s821_s17   ;;  %s694_s16 = sphi %s737_s16, %s820_s16   ;;  %s690_s15 = sphi %s735_s15, %s819_s15  }
   0x4   : > { %p24_p0 = scmp.ge.s32.totalorder %s23_s20, 4  ;;  %p594_p1 = scmp.ge.s32.totalorder %s706_s19, 1 }
   0x5   : > { %p214_p2 = scmp.lt.s32.totalorder %s706_s19, 9 }
   0x6   : > { %s824_s20 = smov (%p24_p0, %s23_s20), 0  ;;  %s826_s21 = smov (!%p24_p0, %s26_s21), %s702_s18 }
   0x7   : > { %p215_p3 = pnand %p594_p1, %p214_p2  ;;  %p28_p4 = scmp.ge.s32.totalorder %s826_s21, 2 }
   0x8   : > { %p262_p5 = scmp.lt.s32.totalorder (!%p215_p3), %s690_s15, 3  ;;  %p266_p6 = scmp.lt.s32.totalorder (!%p215_p3), %s694_s16, 1 }
   0x9   : > { %s828_s21 = smov (%p28_p4, %s826_s21), 0  ;;  %218 = sbr.rel (%p215_p3) target bundleno = 728 (0x2d8), region = 36 }
   0xe   : > { %v708_v0 = vmov 0.0   ;;  %vm709_vm0 = vmmov 0   ;;  %s830_s15 = smov (!%p262_p5, %s690_s15), 3  ;;  %s832_s16 = smov (!%p266_p6, %s694_s16), 1  ;;  %vm296_vm1 = vcmask 64512  }
   0xf   : > { %612 = vmatprep.subr.mxu0 %v708_v0  ;;  %614 = vmatprep.mubr.msk.f32.mxu0 %vm709_vm0, %v708_v0  ;;  %s595_s22 = sshll.u32 %s830_s15, 3  ;;  %s596_s23 = sshll.u32 %s832_s16, 2 }
  0x10   : > { %617 = vmatprep.subr.mxu1 %v708_v0  ;;  %619 = vmatprep.mubr.msk.f32.mxu1 %vm709_vm0, %v708_v0  ;;  %s271_s24 = sadd.s32 %s596_s23, %s830_s15  ;;  %s265_s28 = scalar_lea.vmem %s814_s0, %s595_s22 }
  0x11   : > { %s769_s25 = sshll.u32 %s271_s24, 3  ;;  %v294_v2 = vld [vmem:[%s265_s28] sm:$0xff]  ;;  %s285_s11 = scalar_lea.vmem %s817_s3, %s595_s22 }
  0x12   : > { %s273_s5 = scalar_lea.vmem %s815_s1, %s769_s25  ;;  %s281_s8 = scalar_lea.vmem %s816_s2, %s769_s25  ;;  %v386_v16 = vld [vmem:[%s285_s11] sm:$0xff] }
  0x13   : > { %v295_v1 = vld [vmem:[%s273_s5] sm:$0xff]  ;;  %s293_s14 = scalar_lea.vmem %s818_s4, %s769_s25 }
  0x14   : > { %613 = vmatpush3.xpose.msk.msra.mxu0 %vm296_vm1, %v295_v1  ;;  %v385_v12 = vld [vmem:[%s281_s8] sm:$0xff] }
  0x15   : > { %618 = vmatpush3.msra.mxu1 %v385_v12 }
  0x17   : > { %615 = vmatmul.mubr.msk.f32.vlgmr.msra.gmra.mxu0 %vm296_vm1, %v294_v2 }
  0xd7   : > { %v369_v3 = vpop.f32.mrf.mxu0 }
  0xd8   : > { %v373_v4 = vmul.f32 0.35355338, %v369_v3 }
  0xd9   : > { %v616_v5 = vpop.f32.mrf.mxu0 }
  0xda   : > { %v374_v6 = vsel %vm296_vm1, %v373_v4, -inf }
  0xdb   : > { %375 = vmax.xlane.f32.xlu0 %v374_v6 }
 0x164   : > { %v376_v7 = vpop.xlane.xlu0 %375 }
 0x165   : > { %v377_v8 = vsub.f32 %v373_v4, %v376_v7 }
 0x167   : > { %v378_v9 = vmul.f32 1.442695, %v377_v8 }
 0x169   : > { %664 = vpow2.f32 %v378_v9 }
 0x176   : > { %v665_v10 = vpop.eup %664 }
 0x177   : > { %v380_v11 = vsel %vm296_vm1, %v665_v10, 0.0 }
 0x178   : > { %381 = vadd.xlane.f32.xlu0 %v380_v11 }
 0x201   : > { %v382_v13 = vpop.xlane.xlu0 %381 }
 0x202   : > { %666 = vrcp.f32 %v382_v13 }
 0x20f   : > { %v667_v14 = vpop.eup %666 }
 0x210   : > { %v384_v15 = vmul.f32 %v667_v14, %v665_v10 }
 0x212   : > { %620 = vmatmul.mubr.msk.f32.vlgmr.msra.gmra.mxu1 %vm296_vm1, %v384_v15 }
 0x2d2   : > { %v456_v17 = vpop.f32.mrf.mxu1 }
 0x2d3   : > { %v457_v18 = vadd.f32 %v456_v17, %v386_v16 }
 0x2d4   : > { %v621_v19 = vpop.f32.mrf.mxu1 }
 0x2d5   : > { %v460_v20 = vmul.f32 0.70710677, %v457_v18 }
 0x2d7   : > { %461 = vst.msk [vmem:[%s293_s14] sm:$0xff] %vm296_vm1, %v460_v20 }
 0x2d8 PF: > { %s14_s19 = sadd.s32 1, %s706_s19   ;;  %s819_s15 = smov %s698_s17 }
 0x2d9   : > { %p11_p7 = scmp.ge.s32.totalorder %s14_s19, 10   ;;  %s820_s16 = smov %s702_s18 }
 0x2da   : > { %s821_s17 = smov %s824_s20  ;;  %s822_s18 = smov %s828_s21 }
 0x2db   :  { %13 = sbr.rel (!%p11_p7) target bundleno = 3 (0x3), region = 75 }

</bundles_post_ra>
